<compile_context>
chip_gen: v6e
topology: v6e:2x2x1
jax: 0.10.0
libtpu: 0.0.40
codegen_flags: <defaults>
</compile_context>

<pallas_src>
import functools

import jax
import jax.numpy as jnp
from jax.experimental import pallas as pl
from jax.experimental.pallas import tpu as pltpu


def _cdiv(a, b):
    return -(-a // b)


def _choose_tile_hw(hw, d, k, itemsize, budget_bytes=16 << 20, cap=32768):
    """Pick the spatial (lane) tile.  If the whole row fits, use it (no masking,
    single grid step per batch element); otherwise the largest multiple of 128
    whose double-buffered IO + f32 intermediates fit the VMEM budget."""
    per_lane_io = 2 * (2 * d * itemsize + 4)        # x in + q out (dbl-buffered) + idx out
    per_lane_tmp = 4 * (2 * k + 3 * d)              # dist/enc (K,T) + x/q/diff (D,T) in f32
    per_lane = max(per_lane_io + per_lane_tmp, 1)
    t = max(128, min(budget_bytes // per_lane, cap))
    t = (t // 128) * 128
    if hw <= t:
        return int(hw)                              # full row: block dim == array dim
    return int(t)


def _vq_kernel(x_ref, neg2e_ref, esq_ref, et_ref,
               q_ref, idx_ref, sse_ref, cnt_ref,
               *, hw, tile_hw, needs_mask):
    """One (batch, spatial-tile) grid step.

    x_ref    : (1, D, T)   input slab (NCHW layout -> lane axis = spatial)
    neg2e_ref: (K, D) f32  -2 * codebook           (hoisted constant)
    esq_ref  : (K, 1) f32  ||codebook||^2          (hoisted constant)
    et_ref   : (D, K) f32  codebook^T              (hoisted constant)
    q_ref    : (1, D, T)   quantized slab (input dtype, NCHW layout)
    idx_ref  : (1, 1, T)   int32 encoding indices
    sse_ref  : (1,1,1,1)   per-block sum of squared error (quantized - input)
    cnt_ref  : (1,1,1,K)   per-block per-codeword counts
    """
    j = pl.program_id(1)

    x = x_ref[0].astype(jnp.float32)                 # (D, T)
    d_dim, t = x.shape
    k_dim = neg2e_ref.shape[0]

    # dist[k, t] = ||e_k||^2 - 2 <x_t, e_k>   (per-row ||x||^2 dropped: argmin-invariant).
    # Tiny contraction dims (D=4) -> VPU broadcast-FMA, not MXU.
    if d_dim <= 16:
        dist = esq_ref[...]                          # (K, 1); broadcasts on first add
        for d in range(d_dim):
            dist = dist + neg2e_ref[:, d:d + 1] * x[d:d + 1, :]
    else:
        dist = jnp.dot(neg2e_ref[...], x, preferred_element_type=jnp.float32) + esq_ref[...]

    # argmin over the codebook (sublane) axis; ties -> smallest index (torch.argmin).
    iota_k = jax.lax.broadcasted_iota(jnp.int32, (k_dim, t), 0)   # (K, T)
    min_d = jnp.min(dist, axis=0, keepdims=True)                  # (1, T)
    idx = jnp.min(jnp.where(dist <= min_d, iota_k, k_dim),
                  axis=0, keepdims=True)                          # (1, T) int32
    enc = (iota_k == idx).astype(jnp.float32)                     # (K, T) transposed one-hot

    # Quantize: q[d, t] = e[idx_t, d].  K=16 -> unrolled VPU select-accumulate.
    if k_dim <= 64:
        q = et_ref[:, 0:1] * enc[0:1, :]
        for kk in range(1, k_dim):
            q = q + et_ref[:, kk:kk + 1] * enc[kk:kk + 1, :]
    else:
        q = jnp.dot(et_ref[...], enc, preferred_element_type=jnp.float32)

    q_ref[...] = q.astype(q_ref.dtype).reshape(1, d_dim, t)
    idx_ref[...] = idx.astype(jnp.int32).reshape(1, 1, t)

    # Per-block partial reductions; mask lanes beyond the valid spatial extent
    # (partial trailing blocks hold unspecified padding data).
    diff = q - x
    if needs_mask:
        lane = j * tile_hw + jax.lax.broadcasted_iota(jnp.int32, (1, t), 1)
        valid = lane < hw                                         # (1, T)
        diff = jnp.where(valid, diff, 0.0)
        enc = jnp.where(valid, enc, 0.0)

    sse_ref[...] = jnp.sum(diff * diff).reshape(1, 1, 1, 1)
    cnt_ref[...] = jnp.sum(enc, axis=1).reshape(1, 1, 1, k_dim)


def _vq_pallas(x_bc_hw, embedding_f32, tile_hw=None):
    """Run the kernel on a (B, C, H*W) view of the NCHW input."""
    b, d, hw = x_bc_hw.shape
    k = embedding_f32.shape[0]
    itemsize = jnp.dtype(x_bc_hw.dtype).itemsize

    if tile_hw is None:
        tile_hw = _choose_tile_hw(hw, d, k, itemsize)
    num_j = _cdiv(hw, tile_hw)
    needs_mask = (hw % tile_hw) != 0

    # Codebook-derived constants hoisted out of the per-tile body (tiny).
    neg2e = -2.0 * embedding_f32                                       # (K, D)
    esq = jnp.sum(embedding_f32 * embedding_f32, axis=1, keepdims=True)  # (K, 1)
    e_t = embedding_f32.T                                              # (D, K)

    grid = (b, num_j)
    out_shapes = (
        jax.ShapeDtypeStruct((b, d, hw), x_bc_hw.dtype),        # quantized (NCHW layout)
        jax.ShapeDtypeStruct((b, 1, hw), jnp.int32),            # encoding indices
        jax.ShapeDtypeStruct((b, num_j, 1, 1), jnp.float32),    # per-block SSE
        jax.ShapeDtypeStruct((b, num_j, 1, k), jnp.float32),    # per-block codeword counts
    )
    grid_spec = pltpu.PrefetchScalarGridSpec(
        num_scalar_prefetch=0,
        grid=grid,
        in_specs=[
            pl.BlockSpec((1, d, tile_hw), lambda bi, ji: (bi, 0, ji)),
            pl.BlockSpec((k, d), lambda bi, ji: (0, 0)),        # -2e      (constant block)
            pl.BlockSpec((k, 1), lambda bi, ji: (0, 0)),        # ||e||^2  (constant block)
            pl.BlockSpec((d, k), lambda bi, ji: (0, 0)),        # e^T      (constant block)
        ],
        out_specs=[
            pl.BlockSpec((1, d, tile_hw), lambda bi, ji: (bi, 0, ji)),
            pl.BlockSpec((1, 1, tile_hw), lambda bi, ji: (bi, 0, ji)),
            pl.BlockSpec((1, 1, 1, 1), lambda bi, ji: (bi, ji, 0, 0)),
            pl.BlockSpec((1, 1, 1, k), lambda bi, ji: (bi, ji, 0, 0)),
        ],
    )

    # VMEM: double-buffered IO tiles + constants + f32 intermediates, capped at
    # 32 MiB (safe on v7x's 64 MiB physical VMEM; plenty of headroom on v5e/v6e).
    io_bytes = 2 * (2 * d * tile_hw * itemsize + tile_hw * 4)
    const_bytes = 2 * (2 * k * d * 4 + k * 4)
    stats_bytes = 2 * (4 + k * 4)
    tmp_bytes = 4 * tile_hw * (2 * k + 3 * d)
    vmem_limit = int(min(32 << 20, max(8 << 20,
                                       2 * (io_bytes + const_bytes + stats_bytes + tmp_bytes))))

    cost = pl.CostEstimate(
        flops=int(b * hw * (4 * k * d + 6 * k)),
        transcendentals=0,
        bytes_accessed=int(b * hw * (2 * d * itemsize + 4)
                           + 3 * k * d * 4 + k * 4
                           + b * num_j * (1 + k) * 4),
    )

    kernel = functools.partial(
        _vq_kernel, hw=hw, tile_hw=tile_hw, needs_mask=needs_mask)

    q3, idx3, sse_p, cnt_p = pl.pallas_call(
        kernel,
        out_shape=out_shapes,
        grid_spec=grid_spec,
        compiler_params=pltpu.CompilerParams(
            dimension_semantics=("parallel", "parallel"),   # shard across v7x TensorCores
            vmem_limit_bytes=vmem_limit,
        ),
        cost_estimate=cost,
    )(x_bc_hw, neg2e, esq, e_t)

    sse = jnp.sum(sse_p)
    counts = jnp.sum(cnt_p, axis=(0, 1, 2))                 # (K,)
    return q3, idx3, sse, counts


def vector_quantizer_forward(x_nchw, embedding, commitment_cost, tile_hw=None):
    """Mirror of VectorQuantizer.forward.

    x_nchw:    (B, C, H, W) with C == embedding_dim
    embedding: (num_embeddings, embedding_dim) codebook
    Returns (loss, quantized_nchw, perplexity, encodings).
    """
    b, c, h, w = x_nchw.shape
    k, d = embedding.shape
    assert c == d

    # Free view: NCHW is already the kernel's lane-dense layout — no transpose.
    x3 = x_nchw.reshape(b, c, h * w)
    q3, idx3, sse, counts = _vq_pallas(x3, embedding.astype(jnp.float32), tile_hw)

    n = b * h * w
    mse = sse / jnp.float32(n * d)
    # Forward values: e_latent_loss == q_latent_loss == mse(quantized, inputs).
    loss = mse + commitment_cost * mse

    avg_probs = counts / jnp.float32(n)
    perplexity = jnp.exp(-jnp.sum(avg_probs * jnp.log(avg_probs + 1e-10)))

    # Quantized comes back directly in NCHW layout; just reshape.
    quantized_nchw = q3.reshape(b, c, h, w)

    # Dense encodings only materialized here, for the module's return value.
    # Index order (b, h, w) matches the PyTorch NHWC flatten order.
    encodings = jax.nn.one_hot(idx3.reshape(-1), k, dtype=jnp.float32)

    # TODO(synk): straight-through estimator / detach() gradient rewiring is a
    # backward-pass concern; the forward value of `inputs + (q - inputs).detach()`
    # is just `quantized`, which is what we return.
    return loss, quantized_nchw, perplexity, encodings


def _reference_forward(x_nchw, embedding, commitment_cost):
    """Pure-JAX reference mirroring the PyTorch code (sanity check).

    The encoding index uses `||e||^2 - 2 x.e` — identical argmin to the PyTorch
    `||x||^2 + ||e||^2 - 2 x.e` (per-row constant shift never changes argmin)."""
    b, c, h, w = x_nchw.shape
    k, d = embedding.shape
    inputs = jnp.transpose(x_nchw, (0, 2, 3, 1))
    flat = inputs.reshape(-1, d).astype(jnp.float32)
    dist = jnp.sum(embedding ** 2, axis=1) - 2.0 * flat @ embedding.T
    idx = jnp.argmin(dist, axis=1)
    enc = jax.nn.one_hot(idx, k, dtype=jnp.float32)
    q = (enc @ embedding).reshape(inputs.shape)
    mse = jnp.mean((q - inputs) ** 2)
    loss = mse + commitment_cost * mse
    avg = jnp.mean(enc, axis=0)
    perp = jnp.exp(-jnp.sum(avg * jnp.log(avg + 1e-10)))
    return loss, jnp.transpose(q, (0, 3, 1, 2)), perp, enc


def _check(out, ref, x, num_embeddings):
    loss, quantized, perplexity, encodings = out
    assert quantized.shape == x.shape
    assert encodings.shape == (x.shape[0] * x.shape[2] * x.shape[3], num_embeddings)
    assert jnp.allclose(loss, ref[0], atol=1e-5, rtol=1e-5)
    assert jnp.allclose(quantized, ref[1], atol=1e-5, rtol=1e-5)
    assert jnp.allclose(perplexity, ref[2], atol=1e-4, rtol=1e-4)
    assert jnp.allclose(encodings, ref[3])


if __name__ == "__main__":
    num_embeddings = 16
    embedding_dim = 4
    commitment_cost = 0.25

    key = jax.random.PRNGKey(0)
    k_emb, k_x1, k_x2 = jax.random.split(key, 3)

    # nn.Embedding weight init: uniform(-1/K, 1/K), deterministic here.
    embedding = jax.random.uniform(
        k_emb, (num_embeddings, embedding_dim),
        minval=-1.0 / num_embeddings, maxval=1.0 / num_embeddings,
        dtype=jnp.float32)

    fwd = jax.jit(functools.partial(
        vector_quantizer_forward, commitment_cost=commitment_cost))

    # Test 1: H*W = 256 (multiple of 128) -> one lane-dense block per batch element.
    x1 = jax.random.normal(k_x1, (2, embedding_dim, 16, 16), dtype=jnp.float32)
    out1 = fwd(x1, embedding)
    jax.block_until_ready(out1)
    _check(out1, _reference_forward(x1, embedding, commitment_cost), x1, num_embeddings)

    # Test 2: H*W = 529 (not a multiple of 128) handled as a single full-row block.
    x2 = jax.random.normal(k_x2, (2, embedding_dim, 23, 23), dtype=jnp.float32)
    out2 = fwd(x2, embedding)
    jax.block_until_ready(out2)
    ref2 = _reference_forward(x2, embedding, commitment_cost)
    _check(out2, ref2, x2, num_embeddings)

    # Test 3: force tile_hw=256 on the 529-lane rows to exercise the partial
    # trailing block + in-kernel masking of the reductions (no wrapper padding).
    fwd_tiled = jax.jit(functools.partial(
        vector_quantizer_forward, commitment_cost=commitment_cost, tile_hw=256))
    out3 = fwd_tiled(x2, embedding)
    jax.block_until_ready(out3)
    _check(out3, ref2, x2, num_embeddings)

    print("KERNEL_OK")
</pallas_src>

<mosaic_0001>
module attributes {stable_mosaic.version = 11 : i64} {
  func.func @_vq_kernel(%arg0: i32, %arg1: i32, %arg2: memref<1x4x256xf32, #tpu.memory_space<vmem>>, %arg3: memref<16x4xf32, #tpu.memory_space<vmem>>, %arg4: memref<16x1xf32, #tpu.memory_space<vmem>>, %arg5: memref<4x16xf32, #tpu.memory_space<vmem>>, %arg6: memref<1x4x256xf32, #tpu.memory_space<vmem>>, %arg7: memref<1x1x256xi32, #tpu.memory_space<vmem>>, %arg8: memref<1x1x1x1xf32, #tpu.memory_space<vmem>>, %arg9: memref<1x1x1x16xf32, #tpu.memory_space<vmem>>) attributes {dimension_semantics = [#tpu.dimension_semantics<parallel>, #tpu.dimension_semantics<parallel>], iteration_bounds = array<i64: 2, 1>, scalar_prefetch = 0 : i64, scratch_operands = 0 : i64, tpu.core_type = #tpu.core_type<tc>, window_params = [{transform_indices = @transform_0, window_bounds = array<i64: 1, 4, 256>}, {pipeline_mode = #tpu.pipeline_mode<synchronous>, transform_indices = @transform_1, window_bounds = array<i64: 16, 4>}, {pipeline_mode = #tpu.pipeline_mode<synchronous>, transform_indices = @transform_2, window_bounds = array<i64: 16, 1>}, {pipeline_mode = #tpu.pipeline_mode<synchronous>, transform_indices = @transform_3, window_bounds = array<i64: 4, 16>}, {transform_indices = @transform_4, window_bounds = array<i64: 1, 4, 256>}, {transform_indices = @transform_5, window_bounds = array<i64: 1, 1, 256>}, {transform_indices = @transform_6, window_bounds = array<i64: 1, 1, 1, 1>}, {transform_indices = @transform_7, window_bounds = array<i64: 1, 1, 1, 16>}]} {
    %c0 = arith.constant 0 : index
    %c0_0 = arith.constant 0 : index
    %c0_1 = arith.constant 0 : index
    %0 = vector.load %arg2[%c0, %c0_0, %c0_1] : memref<1x4x256xf32, #tpu.memory_space<vmem>>, vector<1x4x256xf32>
    %1 = vector.shape_cast %0 : vector<1x4x256xf32> to vector<4x256xf32>
    %c0_2 = arith.constant 0 : index
    %c0_3 = arith.constant 0 : index
    %2 = vector.load %arg4[%c0_2, %c0_3] : memref<16x1xf32, #tpu.memory_space<vmem>>, vector<16x1xf32>
    %c0_4 = arith.constant 0 : index
    %c0_5 = arith.constant 0 : index
    %3 = vector.load %arg3[%c0_4, %c0_5] : memref<16x4xf32, #tpu.memory_space<vmem>>, vector<16x1xf32>
    %4 = vector.extract_strided_slice %1 {offsets = [0, 0], sizes = [1, 256], strides = [1, 1]} : vector<4x256xf32> to vector<1x256xf32>
    %5 = vector.broadcast %3 : vector<16x1xf32> to vector<16x256xf32>
    %6 = vector.broadcast %4 : vector<1x256xf32> to vector<16x256xf32>
    %7 = arith.mulf %5, %6 : vector<16x256xf32>
    %8 = vector.broadcast %2 : vector<16x1xf32> to vector<16x256xf32>
    %9 = arith.addf %8, %7 : vector<16x256xf32>
    %c0_6 = arith.constant 0 : index
    %c1 = arith.constant 1 : index
    %10 = vector.load %arg3[%c0_6, %c1] : memref<16x4xf32, #tpu.memory_space<vmem>>, vector<16x1xf32>
    %11 = vector.extract_strided_slice %1 {offsets = [1, 0], sizes = [1, 256], strides = [1, 1]} : vector<4x256xf32> to vector<1x256xf32>
    %12 = vector.broadcast %10 : vector<16x1xf32> to vector<16x256xf32>
    %13 = vector.broadcast %11 : vector<1x256xf32> to vector<16x256xf32>
    %14 = arith.mulf %12, %13 : vector<16x256xf32>
    %15 = arith.addf %9, %14 : vector<16x256xf32>
    %c0_7 = arith.constant 0 : index
    %c2 = arith.constant 2 : index
    %16 = vector.load %arg3[%c0_7, %c2] : memref<16x4xf32, #tpu.memory_space<vmem>>, vector<16x1xf32>
    %17 = vector.extract_strided_slice %1 {offsets = [2, 0], sizes = [1, 256], strides = [1, 1]} : vector<4x256xf32> to vector<1x256xf32>
    %18 = vector.broadcast %16 : vector<16x1xf32> to vector<16x256xf32>
    %19 = vector.broadcast %17 : vector<1x256xf32> to vector<16x256xf32>
    %20 = arith.mulf %18, %19 : vector<16x256xf32>
    %21 = arith.addf %15, %20 : vector<16x256xf32>
    %c0_8 = arith.constant 0 : index
    %c3 = arith.constant 3 : index
    %22 = vector.load %arg3[%c0_8, %c3] : memref<16x4xf32, #tpu.memory_space<vmem>>, vector<16x1xf32>
    %23 = vector.extract_strided_slice %1 {offsets = [3, 0], sizes = [1, 256], strides = [1, 1]} : vector<4x256xf32> to vector<1x256xf32>
    %24 = vector.broadcast %22 : vector<16x1xf32> to vector<16x256xf32>
    %25 = vector.broadcast %23 : vector<1x256xf32> to vector<16x256xf32>
    %26 = arith.mulf %24, %25 : vector<16x256xf32>
    %27 = arith.addf %21, %26 : vector<16x256xf32>
    %28 = tpu.iota {dimensions = array<i32: 0>} : vector<16x256xi32>
    %cst = arith.constant dense<0x7F800000> : vector<256xf32>
    %29 = vector.multi_reduction <minimumf>, %27, %cst [0] : vector<16x256xf32> to vector<256xf32>
    %30 = vector.shape_cast %29 : vector<256xf32> to vector<1x256xf32>
    %31 = vector.broadcast %30 : vector<1x256xf32> to vector<16x256xf32>
    %32 = arith.cmpf ole, %27, %31 : vector<16x256xf32>
    %c16_i32 = arith.constant 16 : i32
    %33 = vector.broadcast %c16_i32 : i32 to vector<16x256xi32>
    %34 = arith.select %32, %28, %33 : vector<16x256xi1>, vector<16x256xi32>
    %cst_9 = arith.constant dense<2147483647> : vector<256xi32>
    %35 = vector.multi_reduction <minsi>, %34, %cst_9 [0] : vector<16x256xi32> to vector<256xi32>
    %36 = vector.shape_cast %35 : vector<256xi32> to vector<1x256xi32>
    %37 = vector.broadcast %36 : vector<1x256xi32> to vector<16x256xi32>
    %38 = arith.cmpi eq, %28, %37 : vector<16x256xi32>
    %39 = arith.extui %38 : vector<16x256xi1> to vector<16x256xi32>
    %40 = arith.sitofp %39 : vector<16x256xi32> to vector<16x256xf32>
    %c0_10 = arith.constant 0 : index
    %c0_11 = arith.constant 0 : index
    %41 = vector.load %arg5[%c0_10, %c0_11] : memref<4x16xf32, #tpu.memory_space<vmem>>, vector<4x1xf32>
    %42 = vector.extract_strided_slice %40 {offsets = [0, 0], sizes = [1, 256], strides = [1, 1]} : vector<16x256xf32> to vector<1x256xf32>
    %43 = vector.broadcast %41 : vector<4x1xf32> to vector<4x256xf32>
    %44 = vector.broadcast %42 : vector<1x256xf32> to vector<4x256xf32>
    %45 = arith.mulf %43, %44 : vector<4x256xf32>
    %c0_12 = arith.constant 0 : index
    %c1_13 = arith.constant 1 : index
    %46 = vector.load %arg5[%c0_12, %c1_13] : memref<4x16xf32, #tpu.memory_space<vmem>>, vector<4x1xf32>
    %47 = vector.extract_strided_slice %40 {offsets = [1, 0], sizes = [1, 256], strides = [1, 1]} : vector<16x256xf32> to vector<1x256xf32>
    %48 = vector.broadcast %46 : vector<4x1xf32> to vector<4x256xf32>
    %49 = vector.broadcast %47 : vector<1x256xf32> to vector<4x256xf32>
    %50 = arith.mulf %48, %49 : vector<4x256xf32>
    %51 = arith.addf %45, %50 : vector<4x256xf32>
    %c0_14 = arith.constant 0 : index
    %c2_15 = arith.constant 2 : index
    %52 = vector.load %arg5[%c0_14, %c2_15] : memref<4x16xf32, #tpu.memory_space<vmem>>, vector<4x1xf32>
    %53 = vector.extract_strided_slice %40 {offsets = [2, 0], sizes = [1, 256], strides = [1, 1]} : vector<16x256xf32> to vector<1x256xf32>
    %54 = vector.broadcast %52 : vector<4x1xf32> to vector<4x256xf32>
    %55 = vector.broadcast %53 : vector<1x256xf32> to vector<4x256xf32>
    %56 = arith.mulf %54, %55 : vector<4x256xf32>
    %57 = arith.addf %51, %56 : vector<4x256xf32>
    %c0_16 = arith.constant 0 : index
    %c3_17 = arith.constant 3 : index
    %58 = vector.load %arg5[%c0_16, %c3_17] : memref<4x16xf32, #tpu.memory_space<vmem>>, vector<4x1xf32>
    %59 = vector.extract_strided_slice %40 {offsets = [3, 0], sizes = [1, 256], strides = [1, 1]} : vector<16x256xf32> to vector<1x256xf32>
    %60 = vector.broadcast %58 : vector<4x1xf32> to vector<4x256xf32>
    %61 = vector.broadcast %59 : vector<1x256xf32> to vector<4x256xf32>
    %62 = arith.mulf %60, %61 : vector<4x256xf32>
    %63 = arith.addf %57, %62 : vector<4x256xf32>
    %c0_18 = arith.constant 0 : index
    %c4 = arith.constant 4 : index
    %64 = vector.load %arg5[%c0_18, %c4] : memref<4x16xf32, #tpu.memory_space<vmem>>, vector<4x1xf32>
    %65 = vector.extract_strided_slice %40 {offsets = [4, 0], sizes = [1, 256], strides = [1, 1]} : vector<16x256xf32> to vector<1x256xf32>
    %66 = vector.broadcast %64 : vector<4x1xf32> to vector<4x256xf32>
    %67 = vector.broadcast %65 : vector<1x256xf32> to vector<4x256xf32>
    %68 = arith.mulf %66, %67 : vector<4x256xf32>
    %69 = arith.addf %63, %68 : vector<4x256xf32>
    %c0_19 = arith.constant 0 : index
    %c5 = arith.constant 5 : index
    %70 = vector.load %arg5[%c0_19, %c5] : memref<4x16xf32, #tpu.memory_space<vmem>>, vector<4x1xf32>
    %71 = vector.extract_strided_slice %40 {offsets = [5, 0], sizes = [1, 256], strides = [1, 1]} : vector<16x256xf32> to vector<1x256xf32>
    %72 = vector.broadcast %70 : vector<4x1xf32> to vector<4x256xf32>
    %73 = vector.broadcast %71 : vector<1x256xf32> to vector<4x256xf32>
    %74 = arith.mulf %72, %73 : vector<4x256xf32>
    %75 = arith.addf %69, %74 : vector<4x256xf32>
    %c0_20 = arith.constant 0 : index
    %c6 = arith.constant 6 : index
    %76 = vector.load %arg5[%c0_20, %c6] : memref<4x16xf32, #tpu.memory_space<vmem>>, vector<4x1xf32>
    %77 = vector.extract_strided_slice %40 {offsets = [6, 0], sizes = [1, 256], strides = [1, 1]} : vector<16x256xf32> to vector<1x256xf32>
    %78 = vector.broadcast %76 : vector<4x1xf32> to vector<4x256xf32>
    %79 = vector.broadcast %77 : vector<1x256xf32> to vector<4x256xf32>
    %80 = arith.mulf %78, %79 : vector<4x256xf32>
    %81 = arith.addf %75, %80 : vector<4x256xf32>
    %c0_21 = arith.constant 0 : index
    %c7 = arith.constant 7 : index
    %82 = vector.load %arg5[%c0_21, %c7] : memref<4x16xf32, #tpu.memory_space<vmem>>, vector<4x1xf32>
    %83 = vector.extract_strided_slice %40 {offsets = [7, 0], sizes = [1, 256], strides = [1, 1]} : vector<16x256xf32> to vector<1x256xf32>
    %84 = vector.broadcast %82 : vector<4x1xf32> to vector<4x256xf32>
    %85 = vector.broadcast %83 : vector<1x256xf32> to vector<4x256xf32>
    %86 = arith.mulf %84, %85 : vector<4x256xf32>
    %87 = arith.addf %81, %86 : vector<4x256xf32>
    %c0_22 = arith.constant 0 : index
    %c8 = arith.constant 8 : index
    %88 = vector.load %arg5[%c0_22, %c8] : memref<4x16xf32, #tpu.memory_space<vmem>>, vector<4x1xf32>
    %89 = vector.extract_strided_slice %40 {offsets = [8, 0], sizes = [1, 256], strides = [1, 1]} : vector<16x256xf32> to vector<1x256xf32>
    %90 = vector.broadcast %88 : vector<4x1xf32> to vector<4x256xf32>
    %91 = vector.broadcast %89 : vector<1x256xf32> to vector<4x256xf32>
    %92 = arith.mulf %90, %91 : vector<4x256xf32>
    %93 = arith.addf %87, %92 : vector<4x256xf32>
    %c0_23 = arith.constant 0 : index
    %c9 = arith.constant 9 : index
    %94 = vector.load %arg5[%c0_23, %c9] : memref<4x16xf32, #tpu.memory_space<vmem>>, vector<4x1xf32>
    %95 = vector.extract_strided_slice %40 {offsets = [9, 0], sizes = [1, 256], strides = [1, 1]} : vector<16x256xf32> to vector<1x256xf32>
    %96 = vector.broadcast %94 : vector<4x1xf32> to vector<4x256xf32>
    %97 = vector.broadcast %95 : vector<1x256xf32> to vector<4x256xf32>
    %98 = arith.mulf %96, %97 : vector<4x256xf32>
    %99 = arith.addf %93, %98 : vector<4x256xf32>
    %c0_24 = arith.constant 0 : index
    %c10 = arith.constant 10 : index
    %100 = vector.load %arg5[%c0_24, %c10] : memref<4x16xf32, #tpu.memory_space<vmem>>, vector<4x1xf32>
    %101 = vector.extract_strided_slice %40 {offsets = [10, 0], sizes = [1, 256], strides = [1, 1]} : vector<16x256xf32> to vector<1x256xf32>
    %102 = vector.broadcast %100 : vector<4x1xf32> to vector<4x256xf32>
    %103 = vector.broadcast %101 : vector<1x256xf32> to vector<4x256xf32>
    %104 = arith.mulf %102, %103 : vector<4x256xf32>
    %105 = arith.addf %99, %104 : vector<4x256xf32>
    %c0_25 = arith.constant 0 : index
    %c11 = arith.constant 11 : index
    %106 = vector.load %arg5[%c0_25, %c11] : memref<4x16xf32, #tpu.memory_space<vmem>>, vector<4x1xf32>
    %107 = vector.extract_strided_slice %40 {offsets = [11, 0], sizes = [1, 256], strides = [1, 1]} : vector<16x256xf32> to vector<1x256xf32>
    %108 = vector.broadcast %106 : vector<4x1xf32> to vector<4x256xf32>
    %109 = vector.broadcast %107 : vector<1x256xf32> to vector<4x256xf32>
    %110 = arith.mulf %108, %109 : vector<4x256xf32>
    %111 = arith.addf %105, %110 : vector<4x256xf32>
    %c0_26 = arith.constant 0 : index
    %c12 = arith.constant 12 : index
    %112 = vector.load %arg5[%c0_26, %c12] : memref<4x16xf32, #tpu.memory_space<vmem>>, vector<4x1xf32>
    %113 = vector.extract_strided_slice %40 {offsets = [12, 0], sizes = [1, 256], strides = [1, 1]} : vector<16x256xf32> to vector<1x256xf32>
    %114 = vector.broadcast %112 : vector<4x1xf32> to vector<4x256xf32>
    %115 = vector.broadcast %113 : vector<1x256xf32> to vector<4x256xf32>
    %116 = arith.mulf %114, %115 : vector<4x256xf32>
    %117 = arith.addf %111, %116 : vector<4x256xf32>
    %c0_27 = arith.constant 0 : index
    %c13 = arith.constant 13 : index
    %118 = vector.load %arg5[%c0_27, %c13] : memref<4x16xf32, #tpu.memory_space<vmem>>, vector<4x1xf32>
    %119 = vector.extract_strided_slice %40 {offsets = [13, 0], sizes = [1, 256], strides = [1, 1]} : vector<16x256xf32> to vector<1x256xf32>
    %120 = vector.broadcast %118 : vector<4x1xf32> to vector<4x256xf32>
    %121 = vector.broadcast %119 : vector<1x256xf32> to vector<4x256xf32>
    %122 = arith.mulf %120, %121 : vector<4x256xf32>
    %123 = arith.addf %117, %122 : vector<4x256xf32>
    %c0_28 = arith.constant 0 : index
    %c14 = arith.constant 14 : index
    %124 = vector.load %arg5[%c0_28, %c14] : memref<4x16xf32, #tpu.memory_space<vmem>>, vector<4x1xf32>
    %125 = vector.extract_strided_slice %40 {offsets = [14, 0], sizes = [1, 256], strides = [1, 1]} : vector<16x256xf32> to vector<1x256xf32>
    %126 = vector.broadcast %124 : vector<4x1xf32> to vector<4x256xf32>
    %127 = vector.broadcast %125 : vector<1x256xf32> to vector<4x256xf32>
    %128 = arith.mulf %126, %127 : vector<4x256xf32>
    %129 = arith.addf %123, %128 : vector<4x256xf32>
    %c0_29 = arith.constant 0 : index
    %c15 = arith.constant 15 : index
    %130 = vector.load %arg5[%c0_29, %c15] : memref<4x16xf32, #tpu.memory_space<vmem>>, vector<4x1xf32>
    %131 = vector.extract_strided_slice %40 {offsets = [15, 0], sizes = [1, 256], strides = [1, 1]} : vector<16x256xf32> to vector<1x256xf32>
    %132 = vector.broadcast %130 : vector<4x1xf32> to vector<4x256xf32>
    %133 = vector.broadcast %131 : vector<1x256xf32> to vector<4x256xf32>
    %134 = arith.mulf %132, %133 : vector<4x256xf32>
    %135 = arith.addf %129, %134 : vector<4x256xf32>
    %136 = vector.shape_cast %135 : vector<4x256xf32> to vector<1x4x256xf32>
    %c0_30 = arith.constant 0 : index
    %c0_31 = arith.constant 0 : index
    %c0_32 = arith.constant 0 : index
    %137 = vector.load %arg6[%c0_30, %c0_31, %c0_32] : memref<1x4x256xf32, #tpu.memory_space<vmem>>, vector<1x4x256xf32>
    tpu.vector_store %arg6[%c0_30, %c0_31, %c0_32], %136 {strides = array<i32>} : memref<1x4x256xf32, #tpu.memory_space<vmem>>, vector<1x4x256xf32>,
    %138 = vector.shape_cast %36 : vector<1x256xi32> to vector<1x1x256xi32>
    %c0_33 = arith.constant 0 : index
    %c0_34 = arith.constant 0 : index
    %c0_35 = arith.constant 0 : index
    %139 = vector.load %arg7[%c0_33, %c0_34, %c0_35] : memref<1x1x256xi32, #tpu.memory_space<vmem>>, vector<1x1x256xi32>
    tpu.vector_store %arg7[%c0_33, %c0_34, %c0_35], %138 {strides = array<i32>} : memref<1x1x256xi32, #tpu.memory_space<vmem>>, vector<1x1x256xi32>,
    %140 = arith.subf %135, %1 : vector<4x256xf32>
    %141 = arith.mulf %140, %140 : vector<4x256xf32>
    %142 = vector.shape_cast %141 : vector<4x256xf32> to vector<1x4x256xf32>
    %cst_36 = arith.constant dense<0.000000e+00> : vector<1xf32>
    %143 = vector.multi_reduction <add>, %142, %cst_36 [1, 2] : vector<1x4x256xf32> to vector<1xf32>
    %144 = vector.shape_cast %143 : vector<1xf32> to vector<1x1x1xf32>
    %145 = vector.extract %144[0, 0, 0] : f32 from vector<1x1x1xf32>
    %146 = vector.broadcast %145 : f32 to vector<1x1x1x1xf32>
    %c0_37 = arith.constant 0 : index
    %c0_38 = arith.constant 0 : index
    %c0_39 = arith.constant 0 : index
    %c0_40 = arith.constant 0 : index
    %147 = vector.load %arg8[%c0_37, %c0_38, %c0_39, %c0_40] : memref<1x1x1x1xf32, #tpu.memory_space<vmem>>, vector<1x1x1x1xf32>
    tpu.vector_store %arg8[%c0_37, %c0_38, %c0_39, %c0_40], %146 {strides = array<i32>} : memref<1x1x1x1xf32, #tpu.memory_space<vmem>>, vector<1x1x1x1xf32>,
    %cst_41 = arith.constant dense<0.000000e+00> : vector<16xf32>
    %148 = vector.multi_reduction <add>, %40, %cst_41 [1] : vector<16x256xf32> to vector<16xf32>
    %149 = vector.shape_cast %148 : vector<16xf32> to vector<1x1x1x16xf32>
    %c0_42 = arith.constant 0 : index
    %c0_43 = arith.constant 0 : index
    %c0_44 = arith.constant 0 : index
    %c0_45 = arith.constant 0 : index
    %150 = vector.load %arg9[%c0_42, %c0_43, %c0_44, %c0_45] : memref<1x1x1x16xf32, #tpu.memory_space<vmem>>, vector<1x1x1x16xf32>
    tpu.vector_store %arg9[%c0_42, %c0_43, %c0_44, %c0_45], %149 {strides = array<i32>} : memref<1x1x1x16xf32, #tpu.memory_space<vmem>>, vector<1x1x1x16xf32>,
    return
  }
  func.func @transform_0(%arg0: i32, %arg1: i32) -> (i32, i32, i32) {
    %c0_i32 = arith.constant 0 : i32
    %c0_i32_0 = arith.constant 0 : i32
    return %arg0, %c0_i32, %arg1 : i32, i32, i32
  }
  func.func @transform_1(%arg0: i32, %arg1: i32) -> (i32, i32) {
    %c0_i32 = arith.constant 0 : i32
    %c0_i32_0 = arith.constant 0 : i32
    %c0_i32_1 = arith.constant 0 : i32
    return %c0_i32, %c0_i32_0 : i32, i32
  }
  func.func @transform_2(%arg0: i32, %arg1: i32) -> (i32, i32) {
    %c0_i32 = arith.constant 0 : i32
    %c0_i32_0 = arith.constant 0 : i32
    %c0_i32_1 = arith.constant 0 : i32
    return %c0_i32, %c0_i32_0 : i32, i32
  }
  func.func @transform_3(%arg0: i32, %arg1: i32) -> (i32, i32) {
    %c0_i32 = arith.constant 0 : i32
    %c0_i32_0 = arith.constant 0 : i32
    %c0_i32_1 = arith.constant 0 : i32
    return %c0_i32, %c0_i32_0 : i32, i32
  }
  func.func @transform_4(%arg0: i32, %arg1: i32) -> (i32, i32, i32) {
    %c0_i32 = arith.constant 0 : i32
    %c0_i32_0 = arith.constant 0 : i32
    return %arg0, %c0_i32, %arg1 : i32, i32, i32
  }
  func.func @transform_5(%arg0: i32, %arg1: i32) -> (i32, i32, i32) {
    %c0_i32 = arith.constant 0 : i32
    %c0_i32_0 = arith.constant 0 : i32
    return %arg0, %c0_i32, %arg1 : i32, i32, i32
  }
  func.func @transform_6(%arg0: i32, %arg1: i32) -> (i32, i32, i32, i32) {
    %c0_i32 = arith.constant 0 : i32
    %c0_i32_0 = arith.constant 0 : i32
    %c0_i32_1 = arith.constant 0 : i32
    return %arg0, %arg1, %c0_i32, %c0_i32_0 : i32, i32, i32, i32
  }
  func.func @transform_7(%arg0: i32, %arg1: i32) -> (i32, i32, i32, i32) {
    %c0_i32 = arith.constant 0 : i32
    %c0_i32_0 = arith.constant 0 : i32
    %c0_i32_1 = arith.constant 0 : i32
    return %arg0, %arg1, %c0_i32, %c0_i32_0 : i32, i32, i32, i32
  }
}

</mosaic_0001>

<bundles_post_ra>
// kernel: vector_quantizer_forward.1
= control target key start
LH: loop header
LB: loop body
LE: loop exit
PB: predicated region body
PF: predicated region fallthrough
CT: control target
= control target key end

     0   :  { %s1280_s24 = smov 0   ;;  %s1282_s25 = smov 0   ;;  %s1529_s0 = inlined_call_operand.vmem [shape: f32[2,4,256], index: 0, kind: input, shape index: {}]   ;;  %s1530_s1 = inlined_call_operand.vmem [shape: f32[16,4], index: 1, kind: input, shape index: {}]   ;;  %s1531_s2 = inlined_call_operand.vmem [shape: f32[16,1], index: 2, kind: input, shape index: {}]   ;;  %s1532_s3 = inlined_call_operand.vmem [shape: f32[4,16], index: 3, kind: input, shape index: {}]   ;;  %s1533_s4 = inlined_call_operand.vmem [shape: f32[2,4,256], index: 4, kind: output, shape index: {0}]   ;;  %s1534_s5 = inlined_call_operand.vmem [shape: s32[2,1,256], index: 5, kind: output, shape index: {1}]   ;;  %s1535_s6 = inlined_call_operand.vmem [shape: f32[2,1,1,1], index: 6, kind: output, shape index: {2}]   ;;  %s1536_s7 = inlined_call_operand.vmem [shape: f32[2,1,1,16], index: 7, kind: output, shape index: {3}]  }
   0x1   :  { %s1284_s26 = smov 0  }
   0x2 LB: > { %s30_s27 = sadd.s32 1, %s1216_s25  ;;  %p1117_p0 = scmp.ge.s32.totalorder %s1220_s26, 1  ;;  %s1220_s26 = sphi %s1284_s26, %s18_s26   ;;  %s1216_s25 = sphi %s1282_s25, %s1540_s25   ;;  %s1212_s24 = sphi %s1280_s24, %s1539_s24  }
   0x3   : > { %p32_p1 = scmp.ge.s32.totalorder %s30_s27, 2  ;;  %p271_p2 = scmp.lt.s32.totalorder %s1220_s26, 3 }
   0x5   : > { %s1542_s27 = smov (%p32_p1, %s30_s27), 0  ;;  %p272_p3 = pnand %p1117_p0, %p271_p2 }
   0x6   : > { %p332_p4 = scmp.lt.s32.totalorder (!%p272_p3), %s1212_s24, 1 }
   0x7   : > { %275 = sbr.rel (%p272_p3) target bundleno = 441 (0x1b9), region = 36 }
   0xc   : > { %v375_v0 = vld [vmem:[%s1530_s1] sm:$0xff]  ;;  %v1222_v2 = vmov 0   ;;  %v376_v3 = vld [vmem:[%s1530_s1 + $0x8] sm:$0xff]  ;;  %v1223_v5 = vmov 1   ;;  %v1224_v6 = vmov 2   ;;  %v1225_v7 = vmov 3  }
   0xd   : > { %v373_v1 = vld [vmem:[%s1531_s2] sm:$0xff]  ;;  %1176 = vset.pattern.permute.xlu1 %v1222_v2  ;;  %1175 = vset.pattern.permute.xlu0 %v1222_v2  ;;  %v374_v4 = vld [vmem:[%s1531_s2 + $0x8] sm:$0xff]  ;;  %v1226_v9 = vmov 6   ;;  %v1227_v10 = vmov 9   ;;  %v1228_v11 = vmov 4   ;;  %v1229_v12 = vmov 12  }
   0xe   : > { %379 = vperm.xlu0 %1175, %v375_v0   ;;  %412 = vperm.xlu1 %1176, %v373_v1   ;;  %v585_v8 = vld [vmem:[%s1532_s3] sm:$0xf]  ;;  %v1230_v13 = vmov 5   ;;  %v1231_v14 = vmov 15   ;;  %v1232_v15 = vmov 7   ;;  %v1233_v16 = vmov 8  }
   0xf   : > { %v1234_v17 = vmov 10   ;;  %v1235_v18 = vmov 11   ;;  %v1236_v19 = vmov 13   ;;  %v1237_v20 = vmov 14   ;;  %s1544_s24 = smov (!%p332_p4, %s1212_s24), 1 }
  0x10   : > { %v388_v21 = vlaneseq  ;;  %s1129_s15 = sshll.u32 %s1544_s24, 3  ;;  %s1122_s19 = sshll.u32 %s1544_s24, 1 }
  0x11   : > { %s339_s18 = scalar_lea.vmem %s1529_s0, %s1129_s15  ;;  %s358_s22 = scalar_lea.vmem %s1534_s5, %s1122_s19 }
  0x12   : > { %384 = vperm.xlu0 %1175, %v376_v3   ;;  %417 = vperm.xlu1 %1176, %v374_v4   ;;  %v1321_v22 = vshrl.u32 %v388_v21, 7  ;;  %v1334_v29 = vld [vmem:[%s339_s18] sm:$0xff]  ;;  %vm1418_vm14 = vcmp.lt.s32.totalorder %v388_v21, 256  ;;  %s349_s29 = scalar_lea.vmem %s1533_s4, %s1129_s15  ;;  %s371_s9 = scalar_lea.vmem %s1536_s7, %s1544_s24 }
  0x13   : > { %s365_s12 = scalar_lea.vmem %s1535_s6, %s1544_s24 }
  0x14   : > { %v1329_v25 = vsub.s32 0, %v1321_v22  ;;  %v1332_v26 = vsub.s32 4, %v1321_v22  ;;  %v1337_v30 = vsub.s32 1, %v1321_v22  ;;  %v1340_v31 = vsub.s32 5, %v1321_v22 }
  0x15   : > { %v1343_v32 = vsub.s32 2, %v1321_v22  ;;  %v1346_v33 = vsub.s32 6, %v1321_v22  ;;  %v1357_v40 = vsub.s32 3, %v1321_v22  ;;  %v1360_v41 = vsub.s32 7, %v1321_v22 }
  0x16   : > { %1177 = vset.pattern.permute.xlu0 %v1223_v5  ;;  %1178 = vset.pattern.permute.xlu1 %v1223_v5  ;;  %v391_v34 = vrot.slane %v1334_v29, %v1329_v25  ;;  %v395_v35 = vrot.slane %v1334_v29, %v1332_v26  ;;  %v435_v36 = vrot.slane %v1334_v29, %v1337_v30 }
  0x17   : > { %425 = vperm.xlu0 %1177, %v375_v0   ;;  %429 = vperm.xlu1 %1178, %v376_v3   ;;  %v439_v37 = vrot.slane %v1334_v29, %v1340_v31  ;;  %v469_v42 = vrot.slane %v1334_v29, %v1343_v32  ;;  %v473_v43 = vrot.slane %v1334_v29, %v1346_v33 }
  0x18   : > { %v401_v44 = vrot.slane %v391_v34, %v1329_v25  ;;  %v405_v45 = vrot.slane %v395_v35, %v1329_v25  ;;  %v445_v46 = vrot.slane %v435_v36, %v1337_v30  ;;  %v503_v49 = vrot.slane %v1334_v29, %v1357_v40 }
  0x19   : > { %v449_v47 = vrot.slane %v439_v37, %v1337_v30  ;;  %v507_v50 = vrot.slane %v1334_v29, %v1360_v41  ;;  %v479_v53 = vrot.slane %v469_v42, %v1343_v32  ;;  %v483_v54 = vrot.slane %v473_v43, %v1343_v32 }
  0x1a   : > { %v513_v62 = vrot.slane %v503_v49, %v1357_v40 }
  0x1b   : > { %1180 = vset.pattern.permute.xlu0 %v1224_v6  ;;  %1179 = vset.pattern.permute.xlu1 %v1224_v6  ;;  %v517_v63 = vrot.slane %v507_v50, %v1357_v40 }
  0x1c   : > { %463 = vperm.xlu0 %1180, %v376_v3   ;;  %459 = vperm.xlu1 %1179, %v375_v0  }
  0x20   : > { %1181 = vset.pattern.permute.xlu1 %v1225_v7  ;;  %1182 = vset.pattern.permute.xlu0 %v1222_v2 }
  0x21   : > { %493 = vperm.xlu1 %1181, %v375_v0   ;;  %588 = vperm.xlu0 %1182, %v585_v8  }
  0x25   : > { %497 = vperm.xlu1 %1181, %v376_v3   ;;  %1185 = vset.pattern.permute.xlu0 %v1225_v7 }
  0x26   : > { %634 = vperm.xlu0 %1185, %v585_v8  }
  0x29   : > { %1183 = vset.pattern.permute.xlu1 %v1223_v5 }
  0x2a   : > { %602 = vperm.xlu1 %1183, %v585_v8   ;;  %1188 = vset.pattern.permute.xlu0 %v1226_v9 }
  0x2b   : > { %682 = vperm.xlu0 %1188, %v585_v8  }
  0x2e   : > { %1184 = vset.pattern.permute.xlu1 %v1224_v6 }
  0x2f   : > { %618 = vperm.xlu1 %1184, %v585_v8   ;;  %1191 = vset.pattern.permute.xlu0 %v1227_v10 }
  0x30   : > { %730 = vperm.xlu0 %1191, %v585_v8  }
  0x33   : > { %1186 = vset.pattern.permute.xlu1 %v1228_v11 }
  0x34   : > { %650 = vperm.xlu1 %1186, %v585_v8   ;;  %1194 = vset.pattern.permute.xlu0 %v1229_v12 }
  0x35   : > { %778 = vperm.xlu0 %1194, %v585_v8  }
  0x38   : > { %1187 = vset.pattern.permute.xlu1 %v1230_v13 }
  0x39   : > { %666 = vperm.xlu1 %1187, %v585_v8   ;;  %1197 = vset.pattern.permute.xlu0 %v1231_v14 }
  0x3a   : > { %826 = vperm.xlu0 %1197, %v585_v8  }
  0x3d   : > { %1189 = vset.pattern.permute.xlu1 %v1232_v15 }
  0x3e   : > { %698 = vperm.xlu1 %1189, %v585_v8  }
  0x42   : > { %1190 = vset.pattern.permute.xlu1 %v1233_v16 }
  0x43   : > { %714 = vperm.xlu1 %1190, %v585_v8  }
  0x47   : > { %1192 = vset.pattern.permute.xlu1 %v1234_v17 }
  0x48   : > { %746 = vperm.xlu1 %1192, %v585_v8  }
  0x4c   : > { %1193 = vset.pattern.permute.xlu1 %v1235_v18 }
  0x4d   : > { %762 = vperm.xlu1 %1193, %v585_v8  }
  0x51   : > { %1195 = vset.pattern.permute.xlu1 %v1236_v19 }
  0x52   : > { %794 = vperm.xlu1 %1195, %v585_v8  }
  0x56   : > { %1196 = vset.pattern.permute.xlu1 %v1237_v20 }
  0x57   : > { %810 = vperm.xlu1 %1196, %v585_v8  }
  0x89   : > { %v380_v23 = vpop.permute.xlu0 %379  ;;  %v413_v24 = vpop.permute.xlu1 %412 }
  0x8a   : > { %v406_v55 = vmul.f32 %v401_v44, %v380_v23  ;;  %v407_v56 = vmul.f32 %v405_v45, %v380_v23 }
  0x8c   : > { %v420_v5 = vadd.f32 %v413_v24, %v406_v55  ;;  %v421_v6 = vadd.f32 %v413_v24, %v407_v56 }
  0x8d   : > { %v385_v27 = vpop.permute.xlu0 %384  ;;  %v418_v28 = vpop.permute.xlu1 %417 }
  0x8e   : > { %v408_v51 = vmul.f32 %v401_v44, %v385_v27  ;;  %v409_v52 = vmul.f32 %v405_v45, %v385_v27 }
  0x90   : > { %v422_v0 = vadd.f32 %v418_v28, %v408_v51  ;;  %v423_v1 = vadd.f32 %v418_v28, %v409_v52  ;;  %v1383_v51 = vadd.s32 8, %v1321_v22 }
  0x92   : > { %v430_v38 = vpop.permute.xlu1 %429  ;;  %v426_v39 = vpop.permute.xlu0 %425 }
  0x93   : > { %v452_v58 = vmul.f32 %v445_v46, %v430_v38  ;;  %v453_v59 = vmul.f32 %v449_v47, %v430_v38  ;;  %v450_v60 = vmul.f32 %v445_v46, %v426_v39  ;;  %v451_v61 = vmul.f32 %v449_v47, %v426_v39 }
  0x95   : > { %v456_v9 = vadd.f32 %v452_v58, %v422_v0  ;;  %v457_v10 = vadd.f32 %v453_v59, %v423_v1  ;;  %v454_v11 = vadd.f32 %v450_v60, %v420_v5  ;;  %v455_v12 = vadd.f32 %v451_v61, %v421_v6 }
  0x96   : > { %v1238_v1 = vmov 1966171168  }
  0x97   : > { %v460_v48 = vpop.permute.xlu1 %459  ;;  %v464_v57 = vpop.permute.xlu0 %463 }
  0x98   : > { %v486_v2 = vmul.f32 %v479_v53, %v464_v57  ;;  %v487_v3 = vmul.f32 %v483_v54, %v464_v57  ;;  %v484_v7 = vmul.f32 %v479_v53, %v460_v48  ;;  %v485_v8 = vmul.f32 %v483_v54, %v460_v48 }
  0x9a   : > { %v490_v15 = vadd.f32 %v486_v2, %v456_v9  ;;  %v491_v16 = vadd.f32 %v487_v3, %v457_v10  ;;  %v488_v18 = vadd.f32 %v484_v7, %v454_v11  ;;  %v489_v19 = vadd.f32 %v485_v8, %v455_v12 }
  0x9b   : > { %v848_v2 = vunpack.c.l.s4 %v1238_v1 }
  0x9c   : > { %v494_v4 = vpop.permute.xlu1 %493 }
  0x9d   : > { %v518_v13 = vmul.f32 %v513_v62, %v494_v4  ;;  %v519_v14 = vmul.f32 %v517_v63, %v494_v4  ;;  %v849_v8 = vunpack.c.0.s8 %v848_v2 }
  0x9f   : > { %v522_v27 = vadd.f32 %v518_v13, %v488_v18  ;;  %v523_v28 = vadd.f32 %v519_v14, %v489_v19  ;;  %v852_v14 = vsub.s32 %v849_v8, %v1321_v22 }
  0xa0   : > { %v498_v17 = vpop.permute.xlu1 %497 }
  0xa1   : > { %v520_v20 = vmul.f32 %v513_v62, %v498_v17  ;;  %v521_v23 = vmul.f32 %v517_v63, %v498_v17 }
  0xa3   : > { %v524_v34 = vadd.f32 %v520_v20, %v490_v15  ;;  %v525_v35 = vadd.f32 %v521_v23, %v491_v16  ;;  %v589_v15 = vpop.permute.xlu0 %588  ;;  %v1239_v16 = vmov 0.0  }
  0xa5   : > { %v529_v24 = vmin.f32 %v522_v27, %v524_v34  ;;  %v536_v36 = vmin.f32 %v523_v28, %v525_v35  ;;  %v1378_v43 = vpop.permute.xlu1 %602 }
  0xa7   : > { %v530_v37 = vrot.slane %v529_v24, 4  ;;  %v537_v38 = vrot.slane %v536_v36, 4 }
  0xa9   : > { %v531_v39 = vmin.f32 %v529_v24, %v530_v37  ;;  %v538_v42 = vmin.f32 %v536_v36, %v537_v38 }
  0xaa   : > { %v1380_v50 = vpop.permute.xlu1 %618 }
  0xab   : > { %v532_v44 = vrot.slane %v531_v39, 2  ;;  %v539_v45 = vrot.slane %v538_v42, 2 }
  0xad   : > { %v533_v46 = vmin.f32 %v531_v39, %v532_v44  ;;  %v540_v47 = vmin.f32 %v538_v42, %v539_v45 }
  0xaf   : > { %v534_v48 = vrot.slane %v533_v46, 1  ;;  %v541_v49 = vrot.slane %v540_v47, 1  ;;  %v1389_v58 = vpop.permute.xlu1 %650 }
  0xb1   : > { %v535_v52 = vmin.f32 %v533_v46, %v534_v48  ;;  %v542_v53 = vmin.f32 %v540_v47, %v541_v49  ;;  %v635_v48 = vpop.permute.xlu0 %634 }
  0xb3   : > { %vm543_vm0 = vcmp.le.f32.partialorder %v522_v27, %v535_v52  ;;  %vm544_vm1 = vcmp.le.f32.partialorder %v523_v28, %v542_v53  ;;  %vm545_vm2 = vcmp.le.f32.partialorder %v524_v34, %v535_v52  ;;  %vm546_vm3 = vcmp.le.f32.partialorder %v525_v35, %v542_v53 }
  0xb4   : > { %v547_v54 = vsel %vm543_vm0, %v1321_v22, 16  ;;  %v548_v55 = vsel %vm544_vm1, %v1321_v22, 16  ;;  %v549_v56 = vsel %vm545_vm2, %v1383_v51, 16  ;;  %v550_v57 = vsel %vm546_vm3, %v1383_v51, 16  ;;  %v1391_v5 = vpop.permute.xlu1 %666 }
  0xb5   : > { %vm551_vm4 = vcmp.lt.s32.totalorder %v547_v54, %v549_v56  ;;  %vm562_vm5 = vcmp.lt.s32.totalorder %v548_v55, %v550_v57  ;;  %vm872_vm1 = vcmask 1043456   ;;  %vm907_vm2 = vcmask 130112  }
  0xb6   : > { %v552_v59 = vsel %vm551_vm4, %v547_v54, %v549_v56  ;;  %v563_v60 = vsel %vm562_vm5, %v548_v55, %v550_v57  ;;  %vm910_vm3 = vcmask 122880   ;;  %vm886_vm4 = vcmask 0  }
  0xb7   : > { %v553_v61 = vrot.slane %v552_v59, 4  ;;  %v564_v62 = vrot.slane %v563_v60, 4 }
  0xb9   : > { %vm554_vm6 = vcmp.lt.s32.totalorder %v552_v59, %v553_v61  ;;  %vm565_vm7 = vcmp.lt.s32.totalorder %v563_v60, %v564_v62  ;;  %v1393_v11 = vpop.permute.xlu1 %698 }
  0xba   : > { %v555_v63 = vsel %vm554_vm6, %v552_v59, %v553_v61  ;;  %v566_v0 = vsel %vm565_vm7, %v563_v60, %v564_v62 }
  0xbb   : > { %v556_v3 = vrot.slane %v555_v63, 2  ;;  %v567_v4 = vrot.slane %v566_v0, 2 }
  0xbd   : > { %vm557_vm8 = vcmp.lt.s32.totalorder %v555_v63, %v556_v3  ;;  %vm568_vm9 = vcmp.lt.s32.totalorder %v566_v0, %v567_v4 }
  0xbe   : > { %v558_v6 = vsel %vm557_vm8, %v555_v63, %v556_v3  ;;  %v569_v7 = vsel %vm568_vm9, %v566_v0, %v567_v4  ;;  %v715_v38 = vpop.permute.xlu1 %714 }
  0xbf   : > { %v559_v9 = vrot.slane %v558_v6, 1  ;;  %v570_v10 = vrot.slane %v569_v7, 1 }
  0xc1   : > { %vm560_vm10 = vcmp.lt.s32.totalorder %v558_v6, %v559_v9  ;;  %vm571_vm11 = vcmp.lt.s32.totalorder %v569_v7, %v570_v10 }
  0xc2   : > { %v561_v12 = vsel %vm560_vm10, %v558_v6, %v559_v9  ;;  %v572_v13 = vsel %vm571_vm11, %v569_v7, %v570_v10  ;;  %v683_v9 = vpop.permute.xlu0 %682 }
  0xc3   : > { %vm573_vm12 = vcmp.eq.s32.totalorder %v1321_v22, %v561_v12  ;;  %vm574_vm13 = vcmp.eq.s32.totalorder %v1321_v22, %v572_v13  ;;  %v846_v19 = vcombine.low %v561_v12, %v572_v13  ;;  %vm575_vm15 = vcmp.eq.s32.totalorder %v1383_v51, %v561_v12  ;;  %v747_v0 = vpop.permute.xlu1 %746 }
  0xc4   : > { %v1398_v17 = vsel %vm573_vm12, 1.0, %v1239_v16  ;;  %v1400_v18 = vsel %vm574_vm13, 1.0, %v1239_v16  ;;  %vm576_vm0 = vcmp.eq.s32.totalorder %v1383_v51, %v572_v13  ;;  %v1451_v6 = vsel %vm575_vm15, 1.0, %v1239_v16 }
  0xc5   : > { %v608_v20 = vrot.slane %v1398_v17, %v1337_v30  ;;  %v612_v23 = vrot.slane %v1400_v18, %v1337_v30  ;;  %v624_v27 = vrot.slane %v1398_v17, %v1343_v32  ;;  %v628_v28 = vrot.slane %v1400_v18, %v1343_v32 }
  0xc6   : > { %v594_v34 = vrot.slane %v1398_v17, %v1329_v25  ;;  %v598_v35 = vrot.slane %v1400_v18, %v1329_v25  ;;  %v853_v24 = vrot.slane %v846_v19, %v852_v14  ;;  %v656_v45 = vrot.slane %v1398_v17, %v1332_v26 }
  0xc7   : > { %v613_v36 = vmul.f32 %v608_v20, %v1378_v43  ;;  %v614_v37 = vmul.f32 %v612_v23, %v1378_v43  ;;  %v629_v47 = vmul.f32 %v624_v27, %v1380_v50  ;;  %v640_v43 = vrot.slane %v1398_v17, %v1357_v40 }
  0xc8   : > { %v599_v42 = vmul.f32 %v594_v34, %v589_v15  ;;  %v600_v44 = vmul.f32 %v598_v35, %v589_v15  ;;  %v860_v46 = vrot.slane %v853_v24, %v852_v14  ;;  %v644_v49 = vrot.slane %v1400_v18, %v1357_v40  ;;  %v763_v34 = vpop.permute.xlu1 %762 }
  0xc9   : > { %v630_v52 = vmul.f32 %v628_v28, %v1380_v50  ;;  %v660_v55 = vrot.slane %v1400_v18, %v1332_v26  ;;  %v645_v56 = vmul.f32 %v640_v43, %v635_v48  ;;  %v672_v57 = vrot.slane %v1398_v17, %v1340_v31 }
  0xca   : > { %v615_v53 = vadd.f32 %v613_v36, %v599_v42  ;;  %v616_v54 = vadd.f32 %v614_v37, %v600_v44  ;;  %865 = vst.msk [vmem:[%s358_s22] sm:$0x3] %vm1418_vm14, %v860_v46  ;;  %v646_v61 = vmul.f32 %v644_v49, %v635_v48  ;;  %v676_v50 = vrot.slane %v1400_v18, %v1340_v31  ;;  %v731_v37 = vpop.permute.xlu0 %730 }
  0xcb   : > { %v688_v62 = vrot.slane %v1398_v17, %v1346_v33  ;;  %v692_v63 = vrot.slane %v1400_v18, %v1346_v33  ;;  %v661_v1 = vmul.f32 %v656_v45, %v1389_v58  ;;  %v662_v2 = vmul.f32 %v660_v55, %v1389_v58 }
  0xcc   : > { %v631_v59 = vadd.f32 %v629_v47, %v615_v53  ;;  %v632_v60 = vadd.f32 %v630_v52, %v616_v54  ;;  %v1455_v7 = vsel %vm576_vm0, 1.0, %v1239_v16  ;;  %v677_v8 = vmul.f32 %v672_v57, %v1391_v5 }
  0xcd   : > { %v704_v10 = vrot.slane %v1398_v17, %v1360_v41  ;;  %v678_v58 = vmul.f32 %v676_v50, %v1391_v5  ;;  %v708_v19 = vrot.slane %v1400_v18, %v1360_v41  ;;  %v693_v12 = vmul.f32 %v688_v62, %v683_v9  ;;  %v795_v54 = vpop.permute.xlu1 %794 }
  0xce   : > { %v647_v3 = vadd.f32 %v645_v56, %v631_v59  ;;  %v648_v4 = vadd.f32 %v646_v61, %v632_v60  ;;  %v694_v20 = vmul.f32 %v692_v63, %v683_v9  ;;  %v720_v51 = vrot.slane %v1451_v6, %v1329_v25  ;;  %v779_v56 = vpop.permute.xlu0 %778 }
  0xcf   : > { %v724_v13 = vrot.slane %v1455_v7, %v1329_v25  ;;  %v709_v16 = vmul.f32 %v704_v10, %v1393_v11  ;;  %v736_v28 = vrot.slane %v1451_v6, %v1337_v30  ;;  %v710_v24 = vmul.f32 %v708_v19, %v1393_v11 }
  0xd0   : > { %v663_v14 = vadd.f32 %v661_v1, %v647_v3  ;;  %v664_v15 = vadd.f32 %v662_v2, %v648_v4  ;;  %v740_v36 = vrot.slane %v1455_v7, %v1337_v30  ;;  %v752_v39 = vrot.slane %v1451_v6, %v1343_v32 }
  0xd1   : > { %v756_v25 = vrot.slane %v1455_v7, %v1343_v32  ;;  %v888_v42 = vadd.f32 %v1400_v18, %v1398_v17  ;;  %v725_v46 = vmul.f32 %v720_v51, %v715_v38  ;;  %v726_v47 = vmul.f32 %v724_v13, %v715_v38 }
  0xd2   : > { %v679_v23 = vadd.f32 %v677_v8, %v663_v14  ;;  %v680_v27 = vadd.f32 %v678_v58, %v664_v15  ;;  %v741_v48 = vmul.f32 %v736_v28, %v731_v37  ;;  %v742_v11 = vmul.f32 %v740_v36, %v731_v37  ;;  %v811_v3 = vpop.permute.xlu1 %810  ;;  %v827_v58 = vpop.permute.xlu0 %826 }
  0xd3   : > { %889 = vadd.xlane.f32.xlu0 %v888_v42  ;;  %v784_v30 = vrot.slane %v1451_v6, %v1332_v26  ;;  %v788_v52 = vrot.slane %v1455_v7, %v1332_v26  ;;  %v757_v53 = vmul.f32 %v752_v39, %v747_v0  ;;  %v758_v32 = vmul.f32 %v756_v25, %v747_v0 }
  0xd4   : > { %v695_v5 = vadd.f32 %v693_v12, %v679_v23  ;;  %v696_v35 = vadd.f32 %v694_v20, %v680_v27  ;;  %v768_v18 = vrot.slane %v1451_v6, %v1357_v40  ;;  %v772_v38 = vrot.slane %v1455_v7, %v1357_v40 }
  0xd5   : > { %v789_v50 = vmul.f32 %v784_v30, %v779_v56  ;;  %v790_v62 = vmul.f32 %v788_v52, %v779_v56  ;;  %v800_v0 = vrot.slane %v1451_v6, %v1340_v31  ;;  %v804_v1 = vrot.slane %v1455_v7, %v1340_v31 }
  0xd6   : > { %v711_v44 = vadd.f32 %v709_v16, %v695_v5  ;;  %v712_v45 = vadd.f32 %v710_v24, %v696_v35  ;;  %v773_v60 = vmul.f32 %v768_v18, %v763_v34  ;;  %v774_v61 = vmul.f32 %v772_v38, %v763_v34 }
  0xd7   : > { %v832_v2 = vrot.slane %v1451_v6, %v1360_v41  ;;  %v836_v40 = vrot.slane %v1455_v7, %v1360_v41  ;;  %v816_v4 = vrot.slane %v1451_v6, %v1346_v33  ;;  %v820_v8 = vrot.slane %v1455_v7, %v1346_v33 }
  0xd8   : > { %v727_v43 = vadd.f32 %v725_v46, %v711_v44  ;;  %v728_v49 = vadd.f32 %v726_v47, %v712_v45  ;;  %v805_v14 = vmul.f32 %v800_v0, %v795_v54  ;;  %v806_v15 = vmul.f32 %v804_v1, %v795_v54 }
  0xd9   : > { %v821_v12 = vmul.f32 %v816_v4, %v811_v3  ;;  %v822_v20 = vmul.f32 %v820_v8, %v811_v3  ;;  %v866_v41 = vcombine.high %v1334_v29, %v1334_v29  ;;  %v837_v23 = vmul.f32 %v832_v2, %v827_v58 }
  0xda   : > { %v743_v55 = vadd.f32 %v741_v48, %v727_v43  ;;  %v744_v17 = vadd.f32 %v742_v11, %v728_v49  ;;  %v838_v27 = vmul.f32 %v836_v40, %v827_v58  ;;  %v891_v25 = vadd.f32 %v1455_v7, %v1451_v6 }
  0xdb   : > { %v897_v42 = vand.u32 127, %v388_v21 }
  0xdc   : > { %v759_v57 = vadd.f32 %v757_v53, %v743_v55  ;;  %v760_v59 = vadd.f32 %v758_v32, %v744_v17 }
  0xdd   : > { %v902_v44 = vadd.s32 4294967288, %v897_v42 }
  0xde   : > { %v775_v63 = vadd.f32 %v773_v60, %v759_v57  ;;  %v776_v26 = vadd.f32 %v774_v61, %v760_v59 }
  0xdf   : > { %v905_v47 = vsub.s32 %v902_v44, %v1321_v22 }
  0xe0   : > { %v791_v9 = vadd.f32 %v789_v50, %v775_v63  ;;  %v792_v10 = vadd.f32 %v790_v62, %v776_v26 }
  0xe2   : > { %v807_v31 = vadd.f32 %v805_v14, %v791_v9  ;;  %v808_v19 = vadd.f32 %v806_v15, %v792_v10 }
  0xe4   : > { %v823_v51 = vadd.f32 %v821_v12, %v807_v31  ;;  %v824_v13 = vadd.f32 %v822_v20, %v808_v19 }
  0xe6   : > { %v839_v16 = vadd.f32 %v837_v23, %v823_v51  ;;  %v840_v28 = vadd.f32 %v838_v27, %v824_v13 }
  0xe8   : > { %v843_v33 = vcombine.low %v839_v16, %v840_v28  ;;  %v868_v34 = vsub.f32 %v839_v16, %v1334_v29  ;;  %v869_v5 = vsub.f32 %v840_v28, %v866_v41  ;;  %v900_v29 = vsub.s32 %v897_v42, %v1321_v22 }
  0xea   : > { %845 = vst [vmem:[%s349_s29] sm:$0xff] %v843_v33  ;;  %v870_v35 = vmul.f32 %v868_v34, %v868_v34  ;;  %v871_v24 = vmul.f32 %v869_v5, %v869_v5 }
  0xec   : > { %v873_v36 = vsel %vm872_vm1, %v870_v35, 0.0  ;;  %v874_v37 = vsel %vm872_vm1, %v871_v24, 0.0 }
  0xed   : > { %v875_v39 = vadd.f32 %v874_v37, %v873_v36 }
  0xef   : > { %876 = vadd.xlane.f32.xlu1 %v875_v39 }
  0xf3   : > { %892 = vadd.xlane.f32.xlu1 %v891_v25 }
 0x15c   : > { %v890_v48 = vpop.xlane.xlu0 %889 }
 0x15d   : > { %v901_v49 = vrot.slane %v890_v48, %v900_v29 }
 0x178   : > { %v877_v45 = vpop.xlane.xlu1 %876 }
 0x179   : > { %v878_v46 = vrot.slane %v877_v45, 4 }
 0x17b   : > { %v879_v11 = vadd.f32 %v878_v46, %v877_v45 }
 0x17c   : > { %v893_v43 = vpop.xlane.xlu1 %892 }
 0x17d   : > { %v880_v30 = vrot.slane %v879_v11, 2  ;;  %v906_v21 = vrot.slane %v893_v43, %v905_v47 }
 0x17f   : > { %v908_v6 = vsel %vm907_vm2, %v906_v21, %v901_v49  ;;  %v881_v7 = vadd.f32 %v880_v30, %v879_v11 }
 0x180   : > { %911 = vst.msk [vmem:[%s371_s9] sm:$0x1] %vm910_vm3, %v908_v6 }
 0x181   : > { %v882_v52 = vrot.slane %v881_v7, 1 }
 0x183   : > { %v883_v53 = vadd.f32 %v882_v52, %v881_v7 }
 0x185   : > { %1131 = vpush %v883_v53 }
 0x1b6   : > { %s1132_s13 = spop %1131 }
 0x1b7   : > { %v885_v22 = vstv %s1132_s13 }
 0x1b8   : > { %887 = vst.msk [vmem:[%s365_s12] sm:$0x1] %vm886_vm4, %v885_v22 }
 0x1b9 PF: > { %s18_s26 = sadd.s32 1, %s1220_s26   ;;  %s1539_s24 = smov %s1216_s25 }
 0x1ba   : > { %p15_p5 = scmp.ge.s32.totalorder %s18_s26, 4   ;;  %s1540_s25 = smov %s1542_s27 }
 0x1bc   :  { %17 = sbr.rel (!%p15_p5) target bundleno = 2 (0x2), region = 102 }

</bundles_post_ra>
